<compile_context>
chip_gen: v7x
topology: tpu7x:2x2x1
jax: 0.10.0
libtpu: 0.0.40
codegen_flags: <defaults>
</compile_context>

<pallas_src>
import functools

import jax
import jax.numpy as jnp
from jax.experimental import pallas as pl
from jax.experimental.pallas import tpu as pltpu


def _round_up(x, m):
    return ((x + m - 1) // m) * m


def _get_loss_kernel(pred_ref, target_ref, trans_ref, out_ref, acc_ref, *,
                     scale, batch, tb_valid, tile_rows, n_inner, need_mask):
    p = pl.program_id(0)   # outer axis: 1 on v5e/v6e, 2 on v7x for large T*B
    i = pl.program_id(1)   # reduction axis over tiles of the T*B matrix stack

    # Per-sweep init of the lane-parallel VMEM accumulator.
    # NOTE: relies on i being the fastest-varying grid axis and on each
    # TensorCore owning its own scratch instance if axis 0 is core-sharded.
    @pl.when(i == 0)
    def _init():
        acc_ref[...] = jnp.zeros_like(acc_ref)

    row0 = (p * n_inner + i) * tile_rows      # first global row of this tile

    def _compute():
        t = trans_ref[...]                                     # (tile_rows, d, d)
        d = t.shape[-1]
        # gram[b] = T_b @ T_b^T on the MXU with f32 accumulation.
        gram = jnp.einsum("bij,bkj->bik", t, t,
                          preferred_element_type=jnp.float32)  # (tile_rows, d, d)
        # Subtract I on the gram diagonal *before* squaring (no eye tensor is
        # materialized in HBM; mask is built from two 2-D iotas).
        ii = jax.lax.broadcasted_iota(jnp.int32, (d, d), 0)
        jj = jax.lax.broadcasted_iota(jnp.int32, (d, d), 1)
        diff = gram - (ii == jj).astype(jnp.float32)
        fro2 = jnp.sum(diff * diff, axis=2)                    # (tile_rows, d)
        fro2 = jnp.sum(fro2, axis=1, keepdims=True)            # (tile_rows, 1)
        fro = jnp.sqrt(fro2)                                   # EUP sqrt
        if need_mask:
            ridx = jax.lax.broadcasted_iota(jnp.int32, (tile_rows, 1), 0) + row0
            fro = fro * (ridx < tb_valid).astype(jnp.float32)
        # Keep partials lane/sublane-parallel; one tree reduce at finalize.
        acc_ref[...] = acc_ref[...] + fro

    if need_mask:
        # Skip compute for tiles that are entirely zero padding.
        pl.when(row0 < tb_valid)(_compute)
    else:
        _compute()

    # ---- finalize: write one lane-dense output block per parallel slice ----
    @pl.when(i == n_inner - 1)
    def _finalize():
        reg = jnp.sum(acc_ref[...]) * (scale / batch)   # sum_t mean_b ||.||_F * scale

        @pl.when(p == 0)
        def _with_nll():
            # NLL runs exactly once (only on the p==0 slice, last step).
            pred = pred_ref[...]                           # (B, C) log-probs
            cls = jax.lax.broadcasted_iota(jnp.int32, pred.shape, 1)
            onehot = (cls == target_ref[...]).astype(jnp.float32)
            nll = -jnp.sum(pred * onehot) * (1.0 / batch)
            out_ref[...] = jnp.full(out_ref.shape, reg + nll, jnp.float32)

        @pl.when(p != 0)
        def _reg_only():
            out_ref[...] = jnp.full(out_ref.shape, reg, jnp.float32)


def get_loss(pred, target, trans_feat_array, mat_diff_loss_scale=0.001):
    """pred: (B, C) log-probs, target: (B,) int labels,
    trans_feat_array: (T, B, d, d) stack of feature-transform matrices."""
    B, C = pred.shape
    T, B2, d, _ = trans_feat_array.shape
    assert B == B2
    TB = T * B

    pred_f32 = pred.astype(jnp.float32)
    target_2d = target.astype(jnp.int32).reshape(B, 1)
    trans_flat = trans_feat_array.astype(jnp.float32).reshape(TB, d, d)

    # ---- generation-aware sizing -------------------------------------------
    try:
        kind = jax.devices()[0].device_kind.lower()
    except Exception:  # pragma: no cover - defensive default
        kind = ""
    is_v7 = "v7" in kind
    # v7x has only 64 MiB physical VMEM per core -> tighter scoped budget.
    vmem_limit = (32 << 20) if is_v7 else (64 << 20)

    # VMEM accounting uses *lane-padded* bytes: last dim pads to 128 lanes,
    # second-to-last to 8 sublanes.  Budget ~1/6 of the limit for one input
    # tile (x2 for double-buffering, plus gram/diff temporaries and headroom).
    padded_row_bytes = _round_up(d, 8) * _round_up(d, 128) * 4
    rows_cap = max(8, min(1024, (vmem_limit // 6) // padded_row_bytes))

    # Outer split only on v7x (2 TensorCores) and only when each core gets at
    # least one full tile of work; v5e/v6e have a single TC where the split is
    # pure overhead.
    # TODO(synk): verify ("parallel", ...) actually core-shards on v7x; if not,
    # switch axis 0 to pltpu.CORE_PARALLEL / an explicit tensorcore mesh.
    n_par = 2 if (is_v7 and TB >= 2 * rows_cap) else 1

    if n_par == 1 and TB <= rows_cap:
        # Typical PointNet regime: whole stack resident, single grid step,
        # zero padding, no mask.
        tile_rows = TB
    else:
        tile_rows = min(rows_cap, pl.cdiv(TB, n_par))
        tile_rows = max(8, (tile_rows // 8) * 8)
    n_inner = pl.cdiv(TB, tile_rows * n_par)
    tb_pad = n_par * n_inner * tile_rows
    need_mask = tb_pad != TB

    if need_mask:
        trans_flat = jnp.pad(trans_flat, ((0, tb_pad - TB), (0, 0), (0, 0)))

    kernel = functools.partial(
        _get_loss_kernel, scale=float(mat_diff_loss_scale), batch=float(B),
        tb_valid=TB, tile_rows=tile_rows, n_inner=n_inner, need_mask=need_mask)

    cost = pl.CostEstimate(
        flops=2 * TB * d ** 3 + 4 * TB * d * d + 2 * B * C,
        transcendentals=TB,
        bytes_accessed=tb_pad * d * d * 4 + B * C * 4 + B * 4
        + n_par * 8 * 128 * 4)

    out = pl.pallas_call(
        kernel,
        out_shape=jax.ShapeDtypeStruct((n_par, 8, 128), jnp.float32),
        grid=(n_par, n_inner),
        in_specs=[
            # pred / target are tiny: resident whole in VMEM, read once.
            pl.BlockSpec(memory_space=pltpu.MemorySpace.VMEM),
            pl.BlockSpec(memory_space=pltpu.MemorySpace.VMEM),
            # trans is the big tensor: tiled + auto double-buffered.
            pl.BlockSpec((tile_rows, d, d),
                         lambda p, i: (p * n_inner + i, 0, 0)),
        ],
        out_specs=pl.BlockSpec((1, 8, 128), lambda p, i: (p, 0, 0)),
        scratch_shapes=[pltpu.VMEM((tile_rows, 1), jnp.float32)],
        compiler_params=pltpu.CompilerParams(
            dimension_semantics=("parallel", "arbitrary"),
            vmem_limit_bytes=vmem_limit),
        cost_estimate=cost,
    )(pred_f32, target_2d, trans_flat)

    # add the per-slice partial losses (scalar sum; length 1 on v5e/v6e)
    return jnp.sum(out[:, 0, 0])


def _reference_loss(pred, target, trans_feat_array, scale=0.001):
    # Pure-JAX reference of the PyTorch module, for verification.
    nll = -jnp.mean(pred[jnp.arange(pred.shape[0]), target])
    d = trans_feat_array.shape[-1]
    eye = jnp.eye(d, dtype=jnp.float32)
    gram = jnp.einsum("tbij,tbkj->tbik", trans_feat_array, trans_feat_array)
    fro = jnp.sqrt(jnp.sum((gram - eye) ** 2, axis=(-2, -1)))  # (T, B)
    mat = jnp.sum(jnp.mean(fro, axis=1))
    return nll + mat * scale


if __name__ == "__main__":
    B, C, T, D = 2, 16, 2, 32
    key = jax.random.PRNGKey(0)
    k1, k2, k3 = jax.random.split(key, 3)

    logits = jax.random.normal(k1, (B, C), dtype=jnp.float32)
    pred = jax.nn.log_softmax(logits, axis=-1)            # NLLLoss expects log-probs
    target = jax.random.randint(k2, (B,), 0, C, dtype=jnp.int32)
    trans_feat_array = jax.random.normal(k3, (T, B, D, D), dtype=jnp.float32)

    loss = get_loss(pred, target, trans_feat_array)
    loss = jax.block_until_ready(loss)

    ref = _reference_loss(pred, target, trans_feat_array)
    assert jnp.allclose(loss, ref, rtol=1e-5, atol=5e-5), (loss, ref)
    print("KERNEL_OK")
</pallas_src>

<mosaic_0001>
module attributes {stable_mosaic.version = 11 : i64} {
  func.func @_get_loss_kernel(%arg0: i32, %arg1: i32, %arg2: memref<2x16xf32, #tpu.memory_space<vmem>>, %arg3: memref<2x1xi32, #tpu.memory_space<vmem>>, %arg4: memref<4x32x32xf32, #tpu.memory_space<vmem>>, %arg5: memref<1x8x128xf32, #tpu.memory_space<vmem>>, %arg6: memref<4x1xf32, #tpu.memory_space<vmem>>) attributes {dimension_semantics = [#tpu.dimension_semantics<parallel>, #tpu.dimension_semantics<arbitrary>], iteration_bounds = array<i64: 1, 1>, scalar_prefetch = 0 : i64, scratch_operands = 1 : i64, tpu.core_type = #tpu.core_type<tc>, window_params = [{pipeline_mode = #tpu.pipeline_mode<synchronous>, transform_indices = @transform_0, window_bounds = array<i64: 2, 16>}, {pipeline_mode = #tpu.pipeline_mode<synchronous>, transform_indices = @transform_1, window_bounds = array<i64: 2, 1>}, {transform_indices = @transform_2, window_bounds = array<i64: 4, 32, 32>}, {transform_indices = @transform_3, window_bounds = array<i64: 1, 8, 128>}]} {
    %c0_i32 = arith.constant 0 : i32
    %0 = arith.cmpi eq, %arg1, %c0_i32 : i32
    %1 = arith.extui %0 : i1 to i32
    %c0_i32_0 = arith.constant 0 : i32
    %2 = arith.cmpi ne, %1, %c0_i32_0 : i32
    scf.if %2 {
      %cst_11 = arith.constant 0.000000e+00 : f32
      %24 = vector.broadcast %cst_11 : f32 to vector<4x1xf32>
      %c0_12 = arith.constant 0 : index
      %c0_13 = arith.constant 0 : index
      %25 = vector.load %arg6[%c0_12, %c0_13] : memref<4x1xf32, #tpu.memory_space<vmem>>, vector<4x1xf32>
      tpu.vector_store %arg6[%c0_12, %c0_13], %24 {strides = array<i32>} : memref<4x1xf32, #tpu.memory_space<vmem>>, vector<4x1xf32>,
    } else {
    }
    %c0 = arith.constant 0 : index
    %c0_1 = arith.constant 0 : index
    %c0_2 = arith.constant 0 : index
    %3 = vector.load %arg4[%c0, %c0_1, %c0_2] : memref<4x32x32xf32, #tpu.memory_space<vmem>>, vector<4x32x32xf32>
    "tpu.trace_start"() <{level = 10 : i32, message = "bij,bkj->bik"}> : () -> ()
    %cst = arith.constant dense<0.000000e+00> : vector<4x32x32xf32>
    %4 = tpu.matmul %3, %3, %cst {dimension_numbers = #tpu.dot_dimension_numbers<[2], [2], [1], [1], [0, 0, 0, 1, 1, 1], [0], [0]>} : vector<4x32x32xf32>, vector<4x32x32xf32>, vector<4x32x32xf32> -> vector<4x32x32xf32>
    "tpu.trace_stop"() : () -> ()
    %5 = tpu.iota {dimensions = array<i32: 0>} : vector<32x32xi32>
    %6 = tpu.iota {dimensions = array<i32: 1>} : vector<32x32xi32>
    %7 = arith.cmpi eq, %5, %6 : vector<32x32xi32>
    %8 = arith.extui %7 : vector<32x32xi1> to vector<32x32xi32>
    %9 = arith.sitofp %8 : vector<32x32xi32> to vector<32x32xf32>
    %10 = vector.shape_cast %9 : vector<32x32xf32> to vector<1x32x32xf32>
    %11 = vector.broadcast %10 : vector<1x32x32xf32> to vector<4x32x32xf32>
    %12 = arith.subf %4, %11 : vector<4x32x32xf32>
    %13 = arith.mulf %12, %12 : vector<4x32x32xf32>
    %cst_3 = arith.constant dense<0.000000e+00> : vector<4x32xf32>
    %14 = vector.multi_reduction <add>, %13, %cst_3 [2] : vector<4x32x32xf32> to vector<4x32xf32>
    %cst_4 = arith.constant dense<0.000000e+00> : vector<4xf32>
    %15 = vector.multi_reduction <add>, %14, %cst_4 [1] : vector<4x32xf32> to vector<4xf32>
    %16 = vector.shape_cast %15 : vector<4xf32> to vector<4x1xf32>
    %17 = math.sqrt %16 : vector<4x1xf32>
    %c0_5 = arith.constant 0 : index
    %c0_6 = arith.constant 0 : index
    %18 = vector.load %arg6[%c0_5, %c0_6] : memref<4x1xf32, #tpu.memory_space<vmem>>, vector<4x1xf32>
    %19 = arith.addf %18, %17 : vector<4x1xf32>
    %c0_7 = arith.constant 0 : index
    %c0_8 = arith.constant 0 : index
    %20 = vector.load %arg6[%c0_7, %c0_8] : memref<4x1xf32, #tpu.memory_space<vmem>>, vector<4x1xf32>
    tpu.vector_store %arg6[%c0_7, %c0_8], %19 {strides = array<i32>} : memref<4x1xf32, #tpu.memory_space<vmem>>, vector<4x1xf32>,
    %c0_i32_9 = arith.constant 0 : i32
    %21 = arith.cmpi eq, %arg1, %c0_i32_9 : i32
    %22 = arith.extui %21 : i1 to i32
    %c0_i32_10 = arith.constant 0 : i32
    %23 = arith.cmpi ne, %22, %c0_i32_10 : i32
    scf.if %23 {
      %c0_11 = arith.constant 0 : index
      %c0_12 = arith.constant 0 : index
      %24 = vector.load %arg6[%c0_11, %c0_12] : memref<4x1xf32, #tpu.memory_space<vmem>>, vector<4x1xf32>
      %25 = vector.shape_cast %24 : vector<4x1xf32> to vector<1x4x1xf32>
      %cst_13 = arith.constant dense<0.000000e+00> : vector<1xf32>
      %26 = vector.multi_reduction <add>, %25, %cst_13 [1, 2] : vector<1x4x1xf32> to vector<1xf32>
      %27 = vector.shape_cast %26 : vector<1xf32> to vector<1x1x1xf32>
      %28 = vector.extract %27[0, 0, 0] : f32 from vector<1x1x1xf32>
      %cst_14 = arith.constant 5.000000e-04 : f32
      %29 = arith.mulf %28, %cst_14 : f32
      %c0_i32_15 = arith.constant 0 : i32
      %30 = arith.cmpi eq, %arg0, %c0_i32_15 : i32
      %31 = arith.extui %30 : i1 to i32
      %c0_i32_16 = arith.constant 0 : i32
      %32 = arith.cmpi ne, %31, %c0_i32_16 : i32
      scf.if %32 {
        %c0_19 = arith.constant 0 : index
        %c0_20 = arith.constant 0 : index
        %36 = vector.load %arg2[%c0_19, %c0_20] : memref<2x16xf32, #tpu.memory_space<vmem>>, vector<2x16xf32>
        %37 = tpu.iota {dimensions = array<i32: 1>} : vector<2x16xi32>
        %c0_21 = arith.constant 0 : index
        %c0_22 = arith.constant 0 : index
        %38 = vector.load %arg3[%c0_21, %c0_22] : memref<2x1xi32, #tpu.memory_space<vmem>>, vector<2x1xi32>
        %39 = vector.broadcast %38 : vector<2x1xi32> to vector<2x16xi32>
        %40 = arith.cmpi eq, %37, %39 : vector<2x16xi32>
        %41 = arith.extui %40 : vector<2x16xi1> to vector<2x16xi32>
        %42 = arith.sitofp %41 : vector<2x16xi32> to vector<2x16xf32>
        %43 = arith.mulf %36, %42 : vector<2x16xf32>
        %44 = vector.shape_cast %43 : vector<2x16xf32> to vector<1x2x16xf32>
        %cst_23 = arith.constant dense<0.000000e+00> : vector<1xf32>
        %45 = vector.multi_reduction <add>, %44, %cst_23 [1, 2] : vector<1x2x16xf32> to vector<1xf32>
        %46 = vector.shape_cast %45 : vector<1xf32> to vector<1x1x1xf32>
        %47 = vector.extract %46[0, 0, 0] : f32 from vector<1x1x1xf32>
        %cst_24 = arith.constant 0.000000e+00 : f32
        %48 = arith.subf %cst_24, %47 : f32
        %cst_25 = arith.constant 5.000000e-01 : f32
        %49 = arith.mulf %48, %cst_25 : f32
        %50 = arith.addf %29, %49 : f32
        %51 = vector.broadcast %50 : f32 to vector<1x8x128xf32>
        %c0_26 = arith.constant 0 : index
        %c0_27 = arith.constant 0 : index
        %c0_28 = arith.constant 0 : index
        %52 = vector.load %arg5[%c0_26, %c0_27, %c0_28] : memref<1x8x128xf32, #tpu.memory_space<vmem>>, vector<1x8x128xf32>
        tpu.vector_store %arg5[%c0_26, %c0_27, %c0_28], %51 {strides = array<i32>} : memref<1x8x128xf32, #tpu.memory_space<vmem>>, vector<1x8x128xf32>,
      } else {
      }
      %c0_i32_17 = arith.constant 0 : i32
      %33 = arith.cmpi ne, %arg0, %c0_i32_17 : i32
      %34 = arith.extui %33 : i1 to i32
      %c0_i32_18 = arith.constant 0 : i32
      %35 = arith.cmpi ne, %34, %c0_i32_18 : i32
      scf.if %35 {
        %36 = vector.broadcast %29 : f32 to vector<1x8x128xf32>
        %c0_19 = arith.constant 0 : index
        %c0_20 = arith.constant 0 : index
        %c0_21 = arith.constant 0 : index
        %37 = vector.load %arg5[%c0_19, %c0_20, %c0_21] : memref<1x8x128xf32, #tpu.memory_space<vmem>>, vector<1x8x128xf32>
        tpu.vector_store %arg5[%c0_19, %c0_20, %c0_21], %36 {strides = array<i32>} : memref<1x8x128xf32, #tpu.memory_space<vmem>>, vector<1x8x128xf32>,
      } else {
      }
    } else {
    }
    return
  }
  func.func @transform_0(%arg0: i32, %arg1: i32) -> (i32, i32) {
    %c0_i32 = arith.constant 0 : i32
    %c0_i32_0 = arith.constant 0 : i32
    %c0_i32_1 = arith.constant 0 : i32
    return %c0_i32, %c0_i32_0 : i32, i32
  }
  func.func @transform_1(%arg0: i32, %arg1: i32) -> (i32, i32) {
    %c0_i32 = arith.constant 0 : i32
    %c0_i32_0 = arith.constant 0 : i32
    %c0_i32_1 = arith.constant 0 : i32
    return %c0_i32, %c0_i32_0 : i32, i32
  }
  func.func @transform_2(%arg0: i32, %arg1: i32) -> (i32, i32, i32) {
    %c1_i32 = arith.constant 1 : i32
    %0 = arith.muli %arg0, %c1_i32 : i32
    %1 = arith.addi %0, %arg1 : i32
    %c0_i32 = arith.constant 0 : i32
    %c0_i32_0 = arith.constant 0 : i32
    %c0_i32_1 = arith.constant 0 : i32
    return %1, %c0_i32, %c0_i32_0 : i32, i32, i32
  }
  func.func @transform_3(%arg0: i32, %arg1: i32) -> (i32, i32, i32) {
    %c0_i32 = arith.constant 0 : i32
    %c0_i32_0 = arith.constant 0 : i32
    %c0_i32_1 = arith.constant 0 : i32
    return %arg0, %c0_i32, %c0_i32_0 : i32, i32, i32
  }
}

</mosaic_0001>

<bundles_post_ra>
// kernel: tpu_custom_call.1
= control target key start
LH: loop header
LB: loop body
LE: loop exit
PB: predicated region body
PF: predicated region fallthrough
CT: control target
= control target key end

     0   :  { %8 = vsyncpa [#allocation4], 0  ;;  %s1226_s0 = inlined_call_operand.hbm [shape: f32[2,16], index: 0, kind: input, shape index: {}]   ;;  %s1227_s1 = inlined_call_operand.hbm [shape: s32[2,1], index: 1, kind: input, shape index: {}]   ;;  %s1228_s2 = inlined_call_operand.hbm [shape: f32[4,32,32], index: 2, kind: input, shape index: {}]   ;;  %s1229_s3 = inlined_call_operand.hbm [shape: f32[1,8,128], index: 3, kind: output, shape index: {}]  }
   0x1   :  { %9 = vsyncpa [#allocation7], 0 }
   0x2   :  { %10 = vsyncpa [#allocation5], 0  ;;  %s1038_s12 = smov [#allocation6]   ;;  %s1039_s14 = smov [#allocation3]  }
   0x3   :  { %s27_s13 = sshll.u32 %s1038_s12, 4  ;;  %s17_s15 = sshll.u32 %s1039_s14, 4  ;;  %s28_s13 = int_to_ptr.vmem [resolvable:$true] %s27_s13  ;;  %s18_s15 = int_to_ptr.vmem [resolvable:$true] %s17_s15 }
   0x4   :  { %s944_s18 = scalar_lea.hbm %s1227_s1, 32 }
   0x5   :  { %p945_p0 = scmp.ne.s32.totalorder %s1227_s1, %s944_s18  ;;  %p948_p1 = scmp.lt.u32.totalorder %s944_s18, %s1227_s1 }
   0x7   :  { %p950_p2 = pnand %p948_p1, %p945_p0 }
   0x9   :  { %953 = shalt.err (!%p950_p2)
}
   0xa   :  { %s954_s23 = scalar_lea.vmem %s28_s13, 32  ;;  %p959_p4 = scmp.lt.s32.totalorder %s28_s13, %s28_s13 }
   0xb   :  { %p955_p3 = scmp.ne.s32.totalorder %s28_s13, %s954_s23  ;;  %p960_p5 = scmp.lt.s32.totalorder %s954_s23, %s954_s23 }
   0xd   :  { %p961_p6 = por %p960_p5, %p959_p4 }
   0xf   :  { %p962_p7 = pnand %p961_p6, %p955_p3 }
  0x11   :  { %965 = shalt.err (!%p962_p7)
}
  0x12   :  { %30 = dma.hbm_to_vmem [thread:$0]  %s1227_s1, 32, %s28_s13, [#allocation7]  }
  0x13   :  { %s966_s28 = scalar_lea.hbm %s1226_s0, 32 }
  0x14   :  { %p967_p8 = scmp.ne.s32.totalorder %s1226_s0, %s966_s28  ;;  %p970_p9 = scmp.lt.u32.totalorder %s966_s28, %s1226_s0 }
  0x16   :  { %p972_p10 = pnand %p970_p9, %p967_p8 }
  0x18   :  { %975 = shalt.err (!%p972_p10)
}
  0x19   :  { %s976_s6 = scalar_lea.vmem %s18_s15, 32  ;;  %p981_p12 = scmp.lt.s32.totalorder %s18_s15, %s18_s15 }
  0x1a   :  { %p977_p11 = scmp.ne.s32.totalorder %s18_s15, %s976_s6  ;;  %p982_p13 = scmp.lt.s32.totalorder %s976_s6, %s976_s6 }
  0x1c   :  { %p983_p0 = por %p982_p13, %p981_p12 }
  0x1e   :  { %p984_p1 = pnand %p983_p0, %p977_p11 }
  0x20   :  { %987 = shalt.err (!%p984_p1)
}
  0x21   :  { %20 = dma.hbm_to_vmem [thread:$0]  %s1226_s0, 32, %s18_s15, [#allocation4]  }
  0x22   :  { %s1040_s8 = smov [#allocation8]   ;;  %s988_s12 = scalar_lea.hbm %s1228_s2, 2048 }
  0x23   :  { %s41_s9 = sshll.u32 %s1040_s8, 4  ;;  %p989_p2 = scmp.ne.s32.totalorder %s1228_s2, %s988_s12  ;;  %s42_s9 = int_to_ptr.vmem [resolvable:$true] %s41_s9 }
  0x24   :  { %p992_p3 = scmp.lt.u32.totalorder %s988_s12, %s1228_s2 }
  0x26   :  { %p994_p4 = pnand %p992_p3, %p989_p2 }
  0x28   :  { %997 = shalt.err (!%p994_p4)
}
  0x29   :  { %s998_s18 = scalar_lea.vmem %s42_s9, 2048  ;;  %p1003_p6 = scmp.lt.s32.totalorder %s42_s9, %s42_s9 }
  0x2a   :  { %p999_p5 = scmp.ne.s32.totalorder %s42_s9, %s998_s18  ;;  %p1004_p7 = scmp.lt.s32.totalorder %s998_s18, %s998_s18 }
  0x2c   :  { %p1005_p8 = por %p1004_p7, %p1003_p6 }
  0x2e   :  { %p1006_p9 = pnand %p1005_p8, %p999_p5 }
  0x30   :  { %1009 = shalt.err (!%p1006_p9)
}
  0x31   :  { %s1041_s0 = smov 128   ;;  %s1042_s15 = smov 8  }
  0x32   :  { %47 = dma.hbm_to_vmem [thread:$0]  %s1228_s2, 2048, %s42_s9, [#allocation7], %s1041_s0, %s1041_s0, %s1042_s15  }
  0x33   :  { %1032 = dma.done.wait [#allocation4], 32  }
  0x34   :  { %1033 = vsyncadd [#allocation4], 4294967264 }
  0x35   :  { %1034 = dma.done.wait [#allocation7], 2080  }
  0x36   :  { %1035 = vsyncadd [#allocation7], 4294965216  ;;  %vm81_vm0 = vcmask 261120   ;;  %v65_v1 = vld [vmem:[#allocation8] sm:$0xff]  ;;  %v66_v2 = vld [vmem:[#allocation8 + $0x8] sm:$0xff]  ;;  %v470_v25 = vlaneseq  ;;  %v1043_v30 = vmov 0.0  }
  0x37   :  { %vm1104_vm1 = vmpackc.low %vm81_vm0, %vm81_vm0  ;;  %v69_v3 = vld [vmem:[#allocation8 + $0x20] sm:$0xff]  ;;  %v880_v4 = vpack.c.bf16 %v66_v2, %v65_v1  ;;  %v70_v5 = vld [vmem:[#allocation8 + $0x28] sm:$0xff]  ;;  %832 = vmatprep.mubr.msk.f32.mxu0 %vm81_vm0, %v65_v1  ;;  %vm594_vm6 = vcmask 130112   ;;  %vm601_vm7 = vcmask 195712   ;;  %vm608_vm8 = vcmask 261312   ;;  %s1045_s25 = smov [#allocation9]  }
  0x38   :  { %v67_v6 = vld [vmem:[#allocation8 + $0x10] sm:$0xff]  ;;  %v68_v7 = vld [vmem:[#allocation8 + $0x18] sm:$0xff]  ;;  %846 = vmatprep.mubr.msk.f32.mxu1 %vm81_vm0, %v69_v3  ;;  %v892_v8 = vpack.c.bf16 %v70_v5, %v69_v3  ;;  %v73_v13 = vld [vmem:[#allocation8 + $0x40] sm:$0xff]  ;;  %v1156_v26 = vshrl.u32 %v470_v25, 7  ;;  %v1159_v28 = vand.u32 127, %v470_v25  ;;  %vm667_vm9 = vcmask 1041409  }
  0x39   :  { %v886_v9 = vpack.c.bf16 %v68_v7, %v67_v6  ;;  %v71_v10 = vld [vmem:[#allocation8 + $0x30] sm:$0xff]  ;;  %v72_v11 = vld [vmem:[#allocation8 + $0x38] sm:$0xff]  ;;  %882 = vmatprep.subr.msk.bf16.mxu0 %vm1104_vm1, %v880_v4  ;;  %v74_v14 = vld [vmem:[#allocation8 + $0x48] sm:$0xff]  ;;  %vm669_vm10 = vcmask 1042434   ;;  %vm671_vm11 = vcmask 1043459   ;;  %vm674_vm12 = vcmask 257024  }
  0x3a   :  { %v898_v12 = vpack.c.bf16 %v72_v11, %v71_v10  ;;  %894 = vmatprep.subr.msk.bf16.mxu1 %vm1104_vm1, %v892_v8  ;;  %885 = vmatpush3.bf16.xpose.msk.msra.mxu0 %vm1104_vm1, %v880_v4  ;;  %v77_v15 = vld [vmem:[#allocation8 + $0x60] sm:$0xff]  ;;  %v78_v16 = vld [vmem:[#allocation8 + $0x68] sm:$0xff]  ;;  %v904_v17 = vpack.c.bf16 %v74_v14, %v73_v13  ;;  %v75_v19 = vld [vmem:[#allocation8 + $0x50] sm:$0xff]  ;;  %v472_v27 = vadd.s32 8, %v1156_v26  ;;  %v474_v29 = vadd.s32 24, %v1156_v26  ;;  %s745_s26 = sshll.u32 %s1045_s25, 4  ;;  %s746_s26 = int_to_ptr.vmem [resolvable:$true] %s745_s26 }
  0x3b   :  { %897 = vmatpush3.bf16.xpose.msk.msra.mxu1 %vm1104_vm1, %v892_v8  ;;  %888 = vmatprep.subr.msk.bf16.mxu0 %vm1104_vm1, %v886_v9  ;;  %v916_v18 = vpack.c.bf16 %v78_v16, %v77_v15  ;;  %v76_v20 = vld [vmem:[#allocation8 + $0x58] sm:$0xff]  ;;  %v79_v21 = vld [vmem:[#allocation8 + $0x70] sm:$0xff]  ;;  %vm477_vm3 = vcmp.eq.s32.totalorder %v1156_v26, %v1159_v28  ;;  %v473_v33 = vadd.s32 16, %v1156_v26  ;;  %vm63_vm13 = vcmask 3072   ;;  %s1010_s28 = scalar_lea.vmem %s746_s26, 128  ;;  %p1015_p11 = scmp.lt.s32.totalorder %s746_s26, %s746_s26 }
  0x3c   :  { %900 = vmatprep.subr.msk.bf16.mxu1 %vm1104_vm1, %v898_v12  ;;  %v80_v22 = vld [vmem:[#allocation8 + $0x78] sm:$0xff]  ;;  %v910_v23 = vpack.c.bf16 %v76_v20, %v75_v19  ;;  %vm478_vm2 = vcmp.eq.s32.totalorder %v472_v27, %v1159_v28  ;;  %v787_v32 = vsel %vm477_vm3, 1.0, %v1043_v30  ;;  %vm480_vm4 = vcmp.eq.s32.totalorder %v474_v29, %v1159_v28  ;;  %64 = vst.msk [vmem:[#allocation2] sm:$0xf] %vm63_vm13, %v1043_v30  ;;  %p1011_p10 = scmp.ne.s32.totalorder %s746_s26, %s1010_s28  ;;  %p1016_p12 = scmp.lt.s32.totalorder %s1010_s28, %s1010_s28 }
  0x3d   :  { %v922_v24 = vpack.c.bf16 %v80_v22, %v79_v21  ;;  %v788_v31 = vsel %vm478_vm2, 1.0, %v1043_v30  ;;  %v790_v41 = vsel %vm480_vm4, 1.0, %v1043_v30  ;;  %vm479_vm5 = vcmp.eq.s32.totalorder %v473_v33, %v1159_v28 }
  0x3e   :  { %v789_v53 = vsel %vm479_vm5, 1.0, %v1043_v30  ;;  %p1017_p13 = por %p1016_p12, %p1015_p11 }
  0x40   :  { %p1018_p0 = pnand %p1017_p13, %p1011_p10 }
  0x42   :  { %891 = vmatpush3.bf16.xpose.msk.msra.mxu0 %vm1104_vm1, %v886_v9 }
  0x43   :  { %903 = vmatpush3.bf16.xpose.msk.msra.mxu1 %vm1104_vm1, %v898_v12  ;;  %906 = vmatprep.subr.msk.bf16.mxu0 %vm1104_vm1, %v904_v17 }
  0x44   :  { %918 = vmatprep.subr.msk.bf16.mxu1 %vm1104_vm1, %v916_v18 }
  0x49   :  { %833 = vmatmul.mubr.msk.f32.vlgmr.msra.gmra.mrb[0].mxu0 %vm81_vm0, %v66_v2 }
  0x4a   :  { %847 = vmatmul.mubr.msk.f32.vlgmr.msra.gmra.mrb[0].mxu1 %vm81_vm0, %v70_v5  ;;  %909 = vmatpush3.bf16.xpose.msk.msra.mxu0 %vm1104_vm1, %v904_v17 }
  0x4b   :  { %921 = vmatpush3.bf16.xpose.msk.msra.mxu1 %vm1104_vm1, %v916_v18  ;;  %835 = vmatprep.mubr.msk.f32.mxu0 %vm81_vm0, %v67_v6 }
  0x4c   :  { %849 = vmatprep.mubr.msk.f32.mxu1 %vm81_vm0, %v71_v10  ;;  %912 = vmatprep.subr.msk.bf16.mxu0 %vm1104_vm1, %v910_v23 }
  0x4d   :  { %836 = vmatmul.mubr.msk.f32.gmra.mrb[2].mxu0 %vm81_vm0, %v68_v7  ;;  %924 = vmatprep.subr.msk.bf16.mxu1 %vm1104_vm1, %v922_v24 }
  0x4e   :  { %850 = vmatmul.mubr.msk.f32.gmra.mrb[2].mxu1 %vm81_vm0, %v72_v11  ;;  %860 = vmatprep.mubr.msk.f32.mxu0 %vm81_vm0, %v73_v13 }
  0x4f   :  { %874 = vmatprep.mubr.msk.f32.mxu1 %vm81_vm0, %v77_v15 }
  0x52   :  { %915 = vmatpush3.bf16.xpose.msk.msra.mxu0 %vm1104_vm1, %v910_v23 }
  0x53   :  { %927 = vmatpush3.bf16.xpose.msk.msra.mxu1 %vm1104_vm1, %v922_v24  ;;  %vm717_vm1 = vcmask 123904  }
  0x59   :  { %861 = vmatmul.mubr.msk.f32.vlgmr.msra.gmra.mrb[4].mxu0 %vm81_vm0, %v74_v14 }
  0x5a   :  { %875 = vmatmul.mubr.msk.f32.vlgmr.msra.gmra.mrb[4].mxu1 %vm81_vm0, %v78_v16  ;;  %863 = vmatprep.mubr.msk.f32.mxu0 %vm81_vm0, %v75_v19 }
  0x5b   :  { %877 = vmatprep.mubr.msk.f32.mxu1 %vm81_vm0, %v79_v21 }
  0x5d   :  { %864 = vmatmul.mubr.msk.f32.gmra.mrb[6].mxu0 %vm81_vm0, %v76_v20 }
  0x5e   :  { %878 = vmatmul.mubr.msk.f32.gmra.mrb[6].mxu1 %vm81_vm0, %v80_v22 }
 0x11c   :  { %v834_v34 = vpop.f32.mrb[0].mxu0 }
 0x11d   :  { %v490_v35 = vsub.f32 %v834_v34, %v788_v31  ;;  %v848_v36 = vpop.f32.mrb[0].mxu1  ;;  %v160_v37 = vpop.f32.mrb[1].mxu0 }
 0x11e   :  { %v494_v38 = vsub.f32 %v848_v36, %v788_v31  ;;  %v489_v39 = vsub.f32 %v160_v37, %v787_v32  ;;  %v257_v40 = vpop.f32.mrb[1].mxu1 }
 0x11f   :  { %v506_v42 = vmul.f32 %v490_v35, %v490_v35  ;;  %v493_v43 = vsub.f32 %v257_v40, %v787_v32  ;;  %v1044_v40 = vmov 0  }
 0x120   :  { %v510_v44 = vmul.f32 %v494_v38, %v494_v38  ;;  %v837_v45 = vpop.f32.mrb[2].mxu0  ;;  %v505_v46 = vmul.f32 %v489_v39, %v489_v39  ;;  %v709_v39 = vld [vmem:[#allocation6] sm:$0x3]  ;;  %940 = vset.pattern.permute.xlu1 %v1044_v40  ;;  %941 = vset.pattern.permute.xlu0 %v1044_v40 }
 0x121   :  { %v524_v47 = vsel %vm81_vm0, %v506_v42, 0.0  ;;  %v492_v48 = vsub.f32 %v837_v45, %v790_v41  ;;  %v170_v49 = vpop.f32.mrb[3].mxu0  ;;  %v851_v50 = vpop.f32.mrb[2].mxu1  ;;  %v509_v51 = vmul.f32 %v493_v43, %v493_v43 }
 0x122   :  { %v536_v52 = vsel %vm81_vm0, %v510_v44, 0.0  ;;  %525 = vadd.xlane.f32.xlu0 %v524_v47  ;;  %v496_v54 = vsub.f32 %v851_v50, %v790_v41  ;;  %v267_v55 = vpop.f32.mrb[3].mxu1  ;;  %v491_v58 = vsub.f32 %v170_v49, %v789_v53  ;;  %v521_v59 = vsel %vm81_vm0, %v505_v46, 0.0 }
 0x123   :  { %537 = vadd.xlane.f32.xlu1 %v536_v52  ;;  %v508_v56 = vmul.f32 %v492_v48, %v492_v48  ;;  %v495_v60 = vsub.f32 %v267_v55, %v789_v53  ;;  %v533_v61 = vsel %vm81_vm0, %v509_v51, 0.0  ;;  %v596_v49 = vadd.s32 4294967280, %v1159_v28 }
 0x124   :  { %v512_v57 = vmul.f32 %v496_v54, %v496_v54  ;;  %v507_v0 = vmul.f32 %v491_v58, %v491_v58  ;;  %v589_v50 = vadd.s32 4294967288, %v1159_v28  ;;  %v587_v51 = vsub.s32 %v1159_v28, %v1156_v26 }
 0x125   :  { %v530_v62 = vsel %vm81_vm0, %v508_v56, 0.0  ;;  %v511_v1 = vmul.f32 %v495_v60, %v495_v60  ;;  %v603_v54 = vadd.s32 4294967272, %v1159_v28  ;;  %v599_v55 = vsub.s32 %v596_v49, %v1156_v26 }
 0x126   :  { %522 = vadd.xlane.f32.xlu0 %v521_v59  ;;  %v542_v63 = vsel %vm81_vm0, %v512_v57, 0.0  ;;  %v527_v6 = vsel %vm81_vm0, %v507_v0, 0.0  ;;  %v592_v56 = vsub.s32 %v589_v50, %v1156_v26 }
 0x127   :  { %534 = vadd.xlane.f32.xlu1 %v533_v61  ;;  %v539_v10 = vsel %vm81_vm0, %v511_v1, 0.0  ;;  %v606_v61 = vsub.s32 %v603_v54, %v1156_v26 }
 0x12a   :  { %531 = vadd.xlane.f32.xlu0 %v530_v62 }
 0x12b   :  { %543 = vadd.xlane.f32.xlu1 %v542_v63 }
 0x12c   :  { %v862_v2 = vpop.f32.mrb[4].mxu0 }
 0x12d   :  { %v498_v3 = vsub.f32 %v862_v2, %v788_v31  ;;  %v876_v4 = vpop.f32.mrb[4].mxu1  ;;  %v354_v5 = vpop.f32.mrb[5].mxu0 }
 0x12e   :  { %v502_v7 = vsub.f32 %v876_v4, %v788_v31  ;;  %v497_v8 = vsub.f32 %v354_v5, %v787_v32  ;;  %v451_v9 = vpop.f32.mrb[5].mxu1  ;;  %528 = vadd.xlane.f32.xlu0 %v527_v6 }
 0x12f   :  { %v514_v11 = vmul.f32 %v498_v3, %v498_v3  ;;  %v501_v12 = vsub.f32 %v451_v9, %v787_v32  ;;  %540 = vadd.xlane.f32.xlu1 %v539_v10 }
 0x130   :  { %v518_v13 = vmul.f32 %v502_v7, %v502_v7  ;;  %v865_v14 = vpop.f32.mrb[6].mxu0  ;;  %v513_v19 = vmul.f32 %v497_v8, %v497_v8 }
 0x131   :  { %v548_v15 = vsel %vm81_vm0, %v514_v11, 0.0  ;;  %v500_v16 = vsub.f32 %v865_v14, %v790_v41  ;;  %v364_v17 = vpop.f32.mrb[7].mxu0  ;;  %v879_v18 = vpop.f32.mrb[6].mxu1  ;;  %v517_v20 = vmul.f32 %v501_v12, %v501_v12 }
 0x132   :  { %v560_v21 = vsel %vm81_vm0, %v518_v13, 0.0  ;;  %v499_v22 = vsub.f32 %v364_v17, %v789_v53  ;;  %v461_v23 = vpop.f32.mrb[7].mxu1  ;;  %v504_v27 = vsub.f32 %v879_v18, %v790_v41  ;;  %v545_v32 = vsel %vm81_vm0, %v513_v19, 0.0 }
 0x133   :  { %561 = vadd.xlane.f32.xlu0 %v560_v21  ;;  %549 = vadd.xlane.f32.xlu1 %v548_v15  ;;  %v516_v24 = vmul.f32 %v500_v16, %v500_v16  ;;  %v503_v29 = vsub.f32 %v461_v23, %v789_v53  ;;  %v557_v31 = vsel %vm81_vm0, %v517_v20, 0.0 }
 0x134   :  { %v515_v25 = vmul.f32 %v499_v22, %v499_v22  ;;  %v520_v33 = vmul.f32 %v504_v27, %v504_v27 }
 0x135   :  { %v519_v34 = vmul.f32 %v503_v29, %v503_v29  ;;  %v554_v35 = vsel %vm81_vm0, %v516_v24, 0.0 }
 0x136   :  { %v551_v36 = vsel %vm81_vm0, %v515_v25, 0.0  ;;  %v566_v37 = vsel %vm81_vm0, %v520_v33, 0.0 }
 0x137   :  { %558 = vadd.xlane.f32.xlu1 %v557_v31  ;;  %546 = vadd.xlane.f32.xlu0 %v545_v32  ;;  %v563_v38 = vsel %vm81_vm0, %v519_v34, 0.0 }
 0x13b   :  { %555 = vadd.xlane.f32.xlu1 %v554_v35  ;;  %552 = vadd.xlane.f32.xlu0 %v551_v36 }
 0x13f   :  { %567 = vadd.xlane.f32.xlu1 %v566_v37  ;;  %564 = vadd.xlane.f32.xlu0 %v563_v38  ;;  %v685_v38 = vld [vmem:[#allocation2] sm:$0xf] }
 0x150   :  { %711 = vperm.xlu1 %940, %v709_v39  }
 0x1af   :  { %v526_v41 = vpop.xlane.xlu0 %525 }
 0x1b0   :  { %v538_v42 = vpop.xlane.xlu1 %537  ;;  %v593_v1 = vrot.slane %v526_v41, %v592_v56 }
 0x1b1   :  { %v617_v0 = vrot.slane %v538_v42, %v592_v56 }
 0x1b3   :  { %v523_v43 = vpop.xlane.xlu0 %522 }
 0x1b4   :  { %v535_v44 = vpop.xlane.xlu1 %534  ;;  %v588_v58 = vrot.slane %v523_v43, %v587_v51 }
 0x1b5   :  { %v613_v57 = vrot.slane %v535_v44, %v587_v51  ;;  %v708_v44 = vld [vmem:[#allocation3] sm:$0x3] }
 0x1b6   :  { %v595_v4 = vsel %vm594_vm6, %v593_v1, %v588_v58 }
 0x1b7   :  { %v532_v45 = vpop.xlane.xlu0 %531  ;;  %v618_v3 = vsel %vm594_vm6, %v617_v0, %v613_v57 }
 0x1b8   :  { %v544_v46 = vpop.xlane.xlu1 %543  ;;  %v607_v12 = vrot.slane %v532_v45, %v606_v61 }
 0x1b9   :  { %v627_v11 = vrot.slane %v544_v46, %v606_v61 }
 0x1bb   :  { %v529_v47 = vpop.xlane.xlu0 %528 }
 0x1bc   :  { %v541_v48 = vpop.xlane.xlu1 %540  ;;  %v600_v63 = vrot.slane %v529_v47, %v599_v55 }
 0x1bd   :  { %v622_v62 = vrot.slane %v541_v48, %v599_v55 }
 0x1be   :  { %v602_v9 = vsel %vm601_vm7, %v600_v63, %v595_v4 }
 0x1bf   :  { %v623_v8 = vsel %vm601_vm7, %v622_v62, %v618_v3  ;;  %v609_v17 = vsel %vm608_vm8, %v607_v12, %v602_v9 }
 0x1c0   :  { %v562_v52 = vpop.xlane.xlu0 %561  ;;  %v550_v53 = vpop.xlane.xlu1 %549  ;;  %v628_v16 = vsel %vm608_vm8, %v627_v11, %v623_v8 }
 0x1c1   :  { %v636_v5 = vrot.slane %v550_v53, %v592_v56  ;;  %v655_v18 = vrot.slane %v562_v52, %v592_v56  ;;  %v668_v27 = vsel %vm667_vm9, %v628_v16, %v609_v17 }
 0x1c4   :  { %v559_v59 = vpop.xlane.xlu1 %558  ;;  %v547_v60 = vpop.xlane.xlu0 %546 }
 0x1c5   :  { %v632_v2 = vrot.slane %v547_v60, %v587_v51  ;;  %v651_v13 = vrot.slane %v559_v59, %v587_v51 }
 0x1c7   :  { %v637_v14 = vsel %vm594_vm6, %v636_v5, %v632_v2  ;;  %v656_v24 = vsel %vm594_vm6, %v655_v18, %v651_v13 }
 0x1c8   :  { %v556_v6 = vpop.xlane.xlu1 %555  ;;  %v553_v7 = vpop.xlane.xlu0 %552 }
 0x1c9   :  { %v646_v10 = vrot.slane %v556_v6, %v606_v61  ;;  %v641_v26 = vrot.slane %v553_v7, %v599_v55 }
 0x1cb   :  { %v642_v15 = vsel %vm601_vm7, %v641_v26, %v637_v14 }
 0x1cc   :  { %v568_v19 = vpop.xlane.xlu1 %567  ;;  %v565_v20 = vpop.xlane.xlu0 %564  ;;  %v647_v23 = vsel %vm608_vm8, %v646_v10, %v642_v15 }
 0x1cd   :  { %v665_v21 = vrot.slane %v568_v19, %v606_v61  ;;  %v660_v22 = vrot.slane %v565_v20, %v599_v55  ;;  %v670_v31 = vsel %vm669_vm10, %v647_v23, %v668_v27 }
 0x1cf   :  { %v661_v25 = vsel %vm601_vm7, %v660_v22, %v656_v24 }
 0x1d0   :  { %v666_v29 = vsel %vm608_vm8, %v665_v21, %v661_v25  ;;  %v712_v41 = vpop.permute.xlu1 %711 }
 0x1d1   :  { %v672_v32 = vsel %vm671_vm11, %v666_v29, %v670_v31  ;;  %vm713_vm0 = vcmp.eq.s32.totalorder %v1159_v28, %v712_v41 }
 0x1d2   :  { %v675_v33 = vsel %vm674_vm12, %v672_v32, 0.0  ;;  %v791_v43 = vsel %vm713_vm0, 1.0, %v1043_v30 }
 0x1d3   :  { %676 = vadd.xlane.f32.xlu0 %v675_v33  ;;  %v716_v45 = vmul.f32 %v791_v43, %v708_v44 }
 0x1d5   :  { %v718_v48 = vsel %vm717_vm1, %v716_v45, 0.0 }
 0x260   :  { %v677_v34 = vpop.xlane.xlu0 %676 }
 0x261   :  { %942 = vrsqrt.f32 %v677_v34  ;;  %vm680_vm14 = vcmp.eq.f32.partialorder %v677_v34, inf  ;;  %v683_v37 = vand.u32 2147483648, %v677_v34  ;;  %vm682_vm15 = vcmp.eq.f32.partialorder %v677_v34, 0.0 }
 0x26b   :  { %v943_v35 = vpop.eup %942 }
 0x26c   :  { %v679_v36 = vmul.f32 %v943_v35, %v677_v34 }
 0x26e   :  { %v681_v39 = vsel %vm680_vm14, %v677_v34, %v679_v36 }
 0x26f   :  { %v684_v40 = vsel %vm682_vm15, %v683_v37, %v681_v39 }
 0x270   :  { %v686_v42 = vadd.f32 %v685_v38, %v684_v40 }
 0x272   :  { %688 = vst.msk [vmem:[#allocation2] sm:$0xf] %vm63_vm13, %v686_v42 }
 0x279   :  { %v692_v46 = vld [vmem:[#allocation2] sm:$0xf] }
 0x27a   :  { %v693_v47 = vsel %vm63_vm13, %v692_v46, 0.0 }
 0x27b   :  { %694 = vadd.xlane.f32.xlu0 %v693_v47 }
 0x27f   :  { %719 = vadd.xlane.f32.xlu0 %v718_v48 }
 0x308   :  { %v695_v49 = vpop.xlane.xlu0 %694 }
 0x309   :  { %v696_v50 = vrot.slane %v695_v49, 4 }
 0x30b   :  { %v697_v51 = vadd.f32 %v696_v50, %v695_v49 }
 0x30c   :  { %v720_v52 = vpop.xlane.xlu0 %719 }
 0x30d   :  { %v698_v53 = vrot.slane %v697_v51, 2  ;;  %v721_v54 = vrot.slane %v720_v52, 4 }
 0x30f   :  { %v722_v28 = vadd.f32 %v721_v54, %v720_v52  ;;  %v699_v55 = vadd.f32 %v698_v53, %v697_v51 }
 0x311   :  { %v723_v56 = vrot.slane %v722_v28, 2  ;;  %v700_v57 = vrot.slane %v699_v55, 1 }
 0x313   :  { %v724_v30 = vadd.f32 %v723_v56, %v722_v28  ;;  %v701_v58 = vadd.f32 %v700_v57, %v699_v55 }
 0x315   :  { %928 = vpush %v701_v58  ;;  %v725_v59 = vrot.slane %v724_v30, 1 }
 0x317   :  { %v726_v60 = vadd.f32 %v725_v59, %v724_v30 }
 0x319   :  { %930 = vpush %v726_v60 }
 0x346   :  { %s929_s2 = spop %928 }
 0x347   :  { %s703_s23 = smul.f32 0.0005, %s929_s2 }
 0x34a   :  { %s931_s21 = spop %930 }
 0x34b   :  { %s728_s22 = ssub.f32 0.0, %s931_s21 }
 0x34d   :  { %s729_s24 = smul.f32 0.5, %s728_s22 }
 0x34f   :  { %s730_s27 = sadd.f32 %s729_s24, %s703_s23 }
 0x351   :  { %v731_v61 = vstv %s730_s27 }
 0x352   :  { %732 = vst [vmem:[#allocation9] sm:$0xff] %v731_v61 }
 0x353   :  { %1021 = shalt.err (!%p1018_p0)
}
 0x354   :  { %s1022_s4 = scalar_lea.hbm %s1229_s3, 128 }
 0x355   :  { %p1023_p1 = scmp.ne.s32.totalorder %s1229_s3, %s1022_s4  ;;  %p1026_p2 = scmp.lt.u32.totalorder %s1022_s4, %s1229_s3 }
 0x357   :  { %p1028_p3 = pnand %p1026_p2, %p1023_p1 }
 0x359   :  { %1031 = shalt.err (!%p1028_p3)
}
 0x35a   :  { %748 = dma.vmem_to_hbm [thread:$0]  %s746_s26, 128, %s1229_s3, [#allocation5]  }
 0x35b   :  { %1036 = dma.done.wait [#allocation5], 128  }
 0x35c   :  { %1037 = vsyncadd [#allocation5], 4294967168 }
 0x35d   :  { %752 = vsyncpa [#allocation4], 1 }
 0x35e   :  { %753 = vsyncpa [#allocation7], 1 }
 0x35f   :  { %754 = vsyncpa [#allocation5], 1 }

</bundles_post_ra>
